<compile_context>
chip_gen: v5e
topology: v5e:2x2
jax: 0.10.0
libtpu: 0.0.40
codegen_flags: <defaults>
</compile_context>

<pallas_src>
from functools import partial

import numpy as np
import jax
import jax.numpy as jnp
from jax.experimental import pallas as pl
from jax.experimental.pallas import tpu as pltpu


# ----------------------------------------------------------------------------
# Per-channel normalization (plain JAX; too small to justify a kernel launch).
# Must stay separate from the head weights: grid_sample's zeros padding
# happens after normalization.
# ----------------------------------------------------------------------------
def normalize_image(x_chw):
    mean = jnp.array([0.485, 0.456, 0.406], jnp.float32).reshape(3, 1, 1)
    inv_std = 1.0 / jnp.array([0.229, 0.224, 0.225], jnp.float32).reshape(3, 1, 1)
    return (x_chw - mean) * inv_std


# ----------------------------------------------------------------------------
# Augmentation glue (plain JAX): affine_grid + bilinear grid_sample,
# matching torch.nn.functional semantics (zeros padding, align_corners=False).
# ----------------------------------------------------------------------------
def _base_grid(H, W):
    xs = (2.0 * jnp.arange(W, dtype=jnp.float32) + 1.0) / W - 1.0
    ys = (2.0 * jnp.arange(H, dtype=jnp.float32) + 1.0) / H - 1.0
    X, Y = jnp.meshgrid(xs, ys)                      # (H, W) each
    ones = jnp.ones_like(X)
    return jnp.stack([X, Y, ones], axis=-1)          # (H, W, 3) homogeneous


def affine_grid(theta, H, W):
    # theta: (2, 3).  Returns normalized sampling grid (H, W, 2) -> (x, y).
    return _base_grid(H, W) @ theta.T


def grid_sample(img, grid):
    # img: (C, H, W); grid: (Ho, Wo, 2) normalized coords in [-1, 1].
    C, H, W = img.shape
    x = grid[..., 0]
    y = grid[..., 1]
    ix = ((x + 1.0) * W - 1.0) / 2.0
    iy = ((y + 1.0) * H - 1.0) / 2.0
    ix0 = jnp.floor(ix)
    iy0 = jnp.floor(iy)
    ix1 = ix0 + 1.0
    iy1 = iy0 + 1.0
    wx1 = ix - ix0
    wy1 = iy - iy0
    wx0 = 1.0 - wx1
    wy0 = 1.0 - wy1

    def gather(iyc, ixc):
        valid = (ixc >= 0) & (ixc <= W - 1) & (iyc >= 0) & (iyc <= H - 1)
        ixs = jnp.clip(ixc, 0, W - 1).astype(jnp.int32)
        iys = jnp.clip(iyc, 0, H - 1).astype(jnp.int32)
        vals = img[:, iys, ixs]                      # (C, Ho, Wo)
        return jnp.where(valid[None], vals, 0.0)

    return (gather(iy0, ix0) * (wy0 * wx0)[None]
            + gather(iy0, ix1) * (wy0 * wx1)[None]
            + gather(iy1, ix0) * (wy1 * wx0)[None]
            + gather(iy1, ix1) * (wy1 * wx1)[None])


def distribution(x_chw, scale_val, angle_rad):
    C, H, W = x_chw.shape
    # scale(): identity grid * scale_val
    ident = jnp.array([[1.0, 0.0, 0.0], [0.0, 1.0, 0.0]], jnp.float32)
    img = grid_sample(x_chw, affine_grid(ident, H, W) * scale_val)
    # rotate(): theta = R.T with R = [[c,-s],[s,c],[0,0]].T -> [[c, s, 0],[-s, c, 0]]
    c = jnp.cos(angle_rad)
    s = jnp.sin(angle_rad)
    theta = jnp.stack([jnp.stack([c, s, 0.0 * c]),
                       jnp.stack([-s, c, 0.0 * c])])
    return grid_sample(img, affine_grid(theta, H, W))


def augment_features(x_chw, aug_key, n_aug):
    """normalize -> 10x (scale, rotate) -> flattened (n_aug, C*H*W) features."""
    C, H, W = x_chw.shape
    x_norm = normalize_image(x_chw)
    k_scale, k_angle = jax.random.split(aug_key)
    scales = jax.random.uniform(k_scale, (n_aug,), jnp.float32, 0.8, 1.2)
    angles_deg = jax.random.randint(k_angle, (n_aug,), -30, 31).astype(jnp.float32)
    angles_rad = angles_deg * (np.pi / 180.0)
    images = jax.vmap(lambda sv, ar: distribution(x_norm, sv, ar))(scales, angles_rad)
    return images.reshape(n_aug, C * H * W)


# ----------------------------------------------------------------------------
# Head kernel: K-tiled (reduction over D0) matmul against the pre-folded
# weight, f32 accumulation in a persistent VMEM scratch; fused bias + weighted
# mean on the final grid step.  At small D0 the grid collapses to (1,).
#   feats (B_pad, tk) bf16 @ W_fold tile (tk, D3p) bf16 -> acc (B_pad, D3p) f32
#   last step: (acc + fused_bias) weighted-mean over rows -> (1, D3p)
# ----------------------------------------------------------------------------
def head_kernel(feat_ref, w_ref, bias_ref, meanw_ref, o_ref, acc_ref):
    k = pl.program_id(0)

    @pl.when(k == 0)
    def _():
        acc_ref[...] = jnp.zeros_like(acc_ref)

    acc_ref[...] += jnp.dot(feat_ref[...], w_ref[...],
                            preferred_element_type=jnp.float32)

    @pl.when(k == pl.num_programs(0) - 1)
    def _():
        h = acc_ref[...] + bias_ref[...]
        # Weighted mean over the real augmented rows; padded rows have weight 0.
        o_ref[...] = jnp.sum(h * meanw_ref[...], axis=0, keepdims=True)


def _pick_tile_k(d0, max_tile=4096):
    """Largest K tile <= max_tile; single resident block for small d0."""
    if d0 <= max_tile:
        return d0
    for tk in range(max_tile, 127, -128):
        if d0 % tk == 0:
            return tk
    return d0  # fall back to fully resident (no clean divisor)


def prepare_head_params(params, n_aug, stem_is_linear=True):
    """One-time host-side prep (hoisted out of the per-call path).

    Folds the purely linear chain  stem(W0,b0) -> fc(W1,b1) -> fc2(W2,b2) -> +0.5
    into a single (D0, D3p) weight and a (1, D3p) bias, lane-padded to 128, plus
    the per-row mean weights for the sublane-padded batch.
    """
    # The fold is exact ONLY because there is no nonlinearity anywhere in the
    # chain.  It must be removed when the real ResNet-101 trunk (ReLU/BN) is
    # restored.
    assert stem_is_linear, "weight folding is invalid for a nonlinear trunk"

    W0, b0, W1, b1, W2, b2 = params
    D3 = W2.shape[1]
    D3p = ((D3 + 127) // 128) * 128
    W2p = jnp.zeros((W2.shape[0], D3p), jnp.float32).at[:, :D3].set(W2)
    b2p = jnp.zeros((1, D3p), jnp.float32).at[:, :D3].set(b2)

    W_fold = (W0 @ W1) @ W2p                               # (D0, D3p) f32
    bias_fold = b0 @ W1 @ W2p + b1 @ W2p + b2p + 0.5       # (1, D3p)  f32

    # Pad batch to a full bf16 sublane group; mean via per-row weights so the
    # zero-padded rows drop out of the reduction exactly.
    B_pad = ((n_aug + 15) // 16) * 16
    mean_w = jnp.zeros((B_pad, 1), jnp.float32).at[:n_aug].set(1.0 / n_aug)

    return W_fold.astype(jnp.bfloat16), bias_fold, mean_w


def run_head(feats, W_fold_bf, bias_fold, mean_w, *, d_out, max_tile_k=4096):
    """feats: (n_aug, D0) f32 augmented features.  Returns (d_out,) f32."""
    n_aug, D0 = feats.shape
    B_pad = mean_w.shape[0]
    D3p = W_fold_bf.shape[1]

    # Only per-call host work: pad batch rows and cast activations to bf16.
    feats_p = jnp.zeros((B_pad, D0), jnp.bfloat16).at[:n_aug].set(
        feats.astype(jnp.bfloat16))

    tk = _pick_tile_k(D0, max_tile_k)
    grid_k = D0 // tk

    # VMEM budget from actual block bytes (double-buffered K tiles dominate at
    # large d_in); 2x headroom, capped well under v7x's 64 MiB physical VMEM.
    # (The constant-index inputs could be single-buffered via pl.Buffered(1),
    #  but their footprint is negligible here.)
    block_bytes = (
        2 * B_pad * tk * 2       # feats K tile, double-buffered, bf16
        + 2 * tk * D3p * 2       # folded-weight K tile, double-buffered, bf16
        + D3p * 4 + B_pad * 4    # fused bias + mean weights
        + B_pad * D3p * 4        # f32 accumulator scratch
        + D3p * 4                # output tile
    )
    vmem_limit = int(min(max(2 * block_bytes, 4 * 1024 * 1024),
                         28 * 1024 * 1024))

    cost = pl.CostEstimate(
        flops=int(2 * B_pad * D0 * D3p),
        transcendentals=0,
        bytes_accessed=int(2 * (B_pad * D0 + D0 * D3p)
                           + 4 * (2 * D3p + B_pad)),
    )

    out = pl.pallas_call(
        head_kernel,
        out_shape=jax.ShapeDtypeStruct((1, D3p), jnp.float32),
        grid_spec=pltpu.PrefetchScalarGridSpec(
            num_scalar_prefetch=0,
            grid=(grid_k,),
            in_specs=[
                pl.BlockSpec((B_pad, tk), lambda k: (0, k)),   # feats K tile
                pl.BlockSpec((tk, D3p), lambda k: (k, 0)),     # folded weight
                pl.BlockSpec((1, D3p), lambda k: (0, 0)),      # fused bias
                pl.BlockSpec((B_pad, 1), lambda k: (0, 0)),    # mean weights
            ],
            out_specs=pl.BlockSpec((1, D3p), lambda k: (0, 0)),
            scratch_shapes=[pltpu.VMEM((B_pad, D3p), jnp.float32)],
        ),
        compiler_params=pltpu.CompilerParams(
            dimension_semantics=("arbitrary",),   # accumulator carry over K
            vmem_limit_bytes=vmem_limit,
        ),
        cost_estimate=cost,
    )(feats_p, W_fold_bf, bias_fold, mean_w)
    return out[0, :d_out]


# ----------------------------------------------------------------------------
# Full forward (jit-compiled; all constant weight prep is precomputed once).
# ----------------------------------------------------------------------------
def decoding_net_forward(x_chw, W_fold_bf, bias_fold, mean_w, aug_key,
                         *, d_out, n_aug):
    feats = augment_features(x_chw, aug_key, n_aug)
    return run_head(feats, W_fold_bf, bias_fold, mean_w, d_out=d_out)


def decoding_net_forward_ref(x_chw, params, aug_key, n_aug):
    """Pure-JAX f32 reference (unfolded weights) for a tolerance check."""
    W0, b0, W1, b1, W2, b2 = params
    feats = augment_features(x_chw, aug_key, n_aug)
    h0 = feats @ W0 + b0
    h1 = h0 @ W1 + b1
    h2 = h1 @ W2 + b2 + 0.5
    return h2.mean(axis=0)


def init_params(key, d_in, d_stem=2048, d_fc=128, d_out=10):
    k0, k1, k2 = jax.random.split(key, 3)
    W0 = jax.random.normal(k0, (d_in, d_stem), jnp.float32) / jnp.sqrt(float(d_in))
    b0 = jnp.zeros((1, d_stem), jnp.float32)
    W1 = jax.random.normal(k1, (d_stem, d_fc), jnp.float32) / jnp.sqrt(float(d_stem))
    b1 = jnp.zeros((1, d_fc), jnp.float32)
    W2 = jax.random.normal(k2, (d_fc, d_out), jnp.float32) / jnp.sqrt(float(d_fc))
    b2 = jnp.zeros((1, d_out), jnp.float32)
    return (W0, b0, W1, b1, W2, b2)


if __name__ == "__main__":
    key = jax.random.PRNGKey(0)
    k_x, k_p, k_aug = jax.random.split(key, 3)

    C, H, W = 3, 16, 16                      # small CHW image (module implies 3xHxW)
    N_AUG, D_OUT = 10, 10
    x = jax.random.uniform(k_x, (C, H, W), jnp.float32)
    params = init_params(k_p, d_in=C * H * W, d_out=D_OUT)

    # One-time constant prep: fold weights/biases, pad, cast, mean weights.
    W_fold_bf, bias_fold, mean_w = prepare_head_params(params, n_aug=N_AUG)

    fwd = jax.jit(partial(decoding_net_forward, d_out=D_OUT, n_aug=N_AUG))
    preds = fwd(x, W_fold_bf, bias_fold, mean_w, k_aug)
    preds = jax.block_until_ready(preds)

    assert preds.shape == (D_OUT,)
    assert bool(jnp.all(jnp.isfinite(preds)))

    # bf16-weight / bf16-activation kernel vs f32 reference: tolerance check.
    preds_ref = decoding_net_forward_ref(x, params, k_aug, n_aug=N_AUG)
    assert bool(jnp.allclose(preds, preds_ref, atol=0.1, rtol=0.05)), (
        np.asarray(preds), np.asarray(preds_ref))

    print("KERNEL_OK")
</pallas_src>

<mosaic_0001>
module attributes {stable_mosaic.version = 11 : i64} {
  func.func @head_kernel(%arg0: i32, %arg1: memref<16x768xbf16, #tpu.memory_space<vmem>>, %arg2: memref<768x128xbf16, #tpu.memory_space<vmem>>, %arg3: memref<1x128xf32, #tpu.memory_space<vmem>>, %arg4: memref<16x1xf32, #tpu.memory_space<vmem>>, %arg5: memref<1x128xf32, #tpu.memory_space<vmem>>, %arg6: memref<16x128xf32, #tpu.memory_space<vmem>>) attributes {dimension_semantics = [#tpu.dimension_semantics<arbitrary>], iteration_bounds = array<i64: 1>, scalar_prefetch = 0 : i64, scratch_operands = 1 : i64, tpu.core_type = #tpu.core_type<tc>, window_params = [{transform_indices = @transform_0, window_bounds = array<i64: 16, 768>}, {transform_indices = @transform_1, window_bounds = array<i64: 768, 128>}, {pipeline_mode = #tpu.pipeline_mode<synchronous>, transform_indices = @transform_2, window_bounds = array<i64: 1, 128>}, {pipeline_mode = #tpu.pipeline_mode<synchronous>, transform_indices = @transform_3, window_bounds = array<i64: 16, 1>}, {pipeline_mode = #tpu.pipeline_mode<synchronous>, transform_indices = @transform_4, window_bounds = array<i64: 1, 128>}]} {
    %c0_i32 = arith.constant 0 : i32
    %0 = arith.cmpi eq, %arg0, %c0_i32 : i32
    %1 = arith.extui %0 : i1 to i32
    %c0_i32_0 = arith.constant 0 : i32
    %2 = arith.cmpi ne, %1, %c0_i32_0 : i32
    scf.if %2 {
      %cst_10 = arith.constant 0.000000e+00 : f32
      %12 = vector.broadcast %cst_10 : f32 to vector<16x128xf32>
      %c0_11 = arith.constant 0 : index
      %c0_12 = arith.constant 0 : index
      %13 = vector.load %arg6[%c0_11, %c0_12] : memref<16x128xf32, #tpu.memory_space<vmem>>, vector<16x128xf32>
      tpu.vector_store %arg6[%c0_11, %c0_12], %12 {strides = array<i32>} : memref<16x128xf32, #tpu.memory_space<vmem>>, vector<16x128xf32>,
    } else {
    }
    %c0 = arith.constant 0 : index
    %c0_1 = arith.constant 0 : index
    %3 = vector.load %arg6[%c0, %c0_1] : memref<16x128xf32, #tpu.memory_space<vmem>>, vector<16x128xf32>
    %c0_2 = arith.constant 0 : index
    %c0_3 = arith.constant 0 : index
    %4 = vector.load %arg1[%c0_2, %c0_3] : memref<16x768xbf16, #tpu.memory_space<vmem>>, vector<16x768xbf16>
    %c0_4 = arith.constant 0 : index
    %c0_5 = arith.constant 0 : index
    %5 = vector.load %arg2[%c0_4, %c0_5] : memref<768x128xbf16, #tpu.memory_space<vmem>>, vector<768x128xbf16>
    %cst = arith.constant dense<0.000000e+00> : vector<16x128xf32>
    %6 = tpu.matmul %4, %5, %cst {dimension_numbers = #tpu.dot_dimension_numbers<[1], [0], [0], [1], [0, 0, 1, 1], [], []>} : vector<16x768xbf16>, vector<768x128xbf16>, vector<16x128xf32> -> vector<16x128xf32>
    %7 = arith.addf %3, %6 : vector<16x128xf32>
    %c0_6 = arith.constant 0 : index
    %c0_7 = arith.constant 0 : index
    %8 = vector.load %arg6[%c0_6, %c0_7] : memref<16x128xf32, #tpu.memory_space<vmem>>, vector<16x128xf32>
    tpu.vector_store %arg6[%c0_6, %c0_7], %7 {strides = array<i32>} : memref<16x128xf32, #tpu.memory_space<vmem>>, vector<16x128xf32>,
    %c0_i32_8 = arith.constant 0 : i32
    %9 = arith.cmpi eq, %arg0, %c0_i32_8 : i32
    %10 = arith.extui %9 : i1 to i32
    %c0_i32_9 = arith.constant 0 : i32
    %11 = arith.cmpi ne, %10, %c0_i32_9 : i32
    scf.if %11 {
      %c0_10 = arith.constant 0 : index
      %c0_11 = arith.constant 0 : index
      %12 = vector.load %arg6[%c0_10, %c0_11] : memref<16x128xf32, #tpu.memory_space<vmem>>, vector<16x128xf32>
      %c0_12 = arith.constant 0 : index
      %c0_13 = arith.constant 0 : index
      %13 = vector.load %arg3[%c0_12, %c0_13] : memref<1x128xf32, #tpu.memory_space<vmem>>, vector<1x128xf32>
      %14 = vector.broadcast %13 : vector<1x128xf32> to vector<16x128xf32>
      %15 = arith.addf %12, %14 : vector<16x128xf32>
      %c0_14 = arith.constant 0 : index
      %c0_15 = arith.constant 0 : index
      %16 = vector.load %arg4[%c0_14, %c0_15] : memref<16x1xf32, #tpu.memory_space<vmem>>, vector<16x1xf32>
      %17 = vector.broadcast %16 : vector<16x1xf32> to vector<16x128xf32>
      %18 = arith.mulf %15, %17 : vector<16x128xf32>
      %cst_16 = arith.constant dense<0.000000e+00> : vector<128xf32>
      %19 = vector.multi_reduction <add>, %18, %cst_16 [0] : vector<16x128xf32> to vector<128xf32>
      %20 = vector.shape_cast %19 : vector<128xf32> to vector<1x128xf32>
      %c0_17 = arith.constant 0 : index
      %c0_18 = arith.constant 0 : index
      %21 = vector.load %arg5[%c0_17, %c0_18] : memref<1x128xf32, #tpu.memory_space<vmem>>, vector<1x128xf32>
      tpu.vector_store %arg5[%c0_17, %c0_18], %20 {strides = array<i32>} : memref<1x128xf32, #tpu.memory_space<vmem>>, vector<1x128xf32>,
    } else {
    }
    return
  }
  func.func @transform_0(%arg0: i32) -> (i32, i32) {
    %c0_i32 = arith.constant 0 : i32
    %c0_i32_0 = arith.constant 0 : i32
    return %c0_i32, %arg0 : i32, i32
  }
  func.func @transform_1(%arg0: i32) -> (i32, i32) {
    %c0_i32 = arith.constant 0 : i32
    %c0_i32_0 = arith.constant 0 : i32
    return %arg0, %c0_i32 : i32, i32
  }
  func.func @transform_2(%arg0: i32) -> (i32, i32) {
    %c0_i32 = arith.constant 0 : i32
    %c0_i32_0 = arith.constant 0 : i32
    %c0_i32_1 = arith.constant 0 : i32
    return %c0_i32, %c0_i32_0 : i32, i32
  }
  func.func @transform_3(%arg0: i32) -> (i32, i32) {
    %c0_i32 = arith.constant 0 : i32
    %c0_i32_0 = arith.constant 0 : i32
    %c0_i32_1 = arith.constant 0 : i32
    return %c0_i32, %c0_i32_0 : i32, i32
  }
  func.func @transform_4(%arg0: i32) -> (i32, i32) {
    %c0_i32 = arith.constant 0 : i32
    %c0_i32_0 = arith.constant 0 : i32
    %c0_i32_1 = arith.constant 0 : i32
    return %c0_i32, %c0_i32_0 : i32, i32
  }
}

</mosaic_0001>

<bundles_post_ra>
// kernel: cos.1
= control target key start
LH: loop header
LB: loop body
LE: loop exit
PB: predicated region body
PF: predicated region fallthrough
CT: control target
= control target key end

     0   :  { %v168_v12 = vmov 683565275   ;;  %v169_v14 = vmov 2475754826   ;;  %v170_v16 = vmov 2131351028   ;;  %s245_s0 = inlined_call_operand.vmem [shape: f32[10], index: 0, kind: input, shape index: {}]   ;;  %s246_s1 = inlined_call_operand.vmem [shape: f32[10], index: 1, kind: output, shape index: {}]  }
   0x1   :  { %v188_v0 = vld [vmem:[%s245_s0] sm:$0x1]  ;;  %v171_v18 = vmov 2102212464   ;;  %v172_v20 = vmov 920167782  }
   0x2   :  { %v6_v1 = vand.u32 2139095040, %v188_v0  ;;  %v3_v3 = vand.u32 2147483647, %v188_v0  ;;  %v173_v26 = vmov 1326507024   ;;  %vm5_vm12 = vcmp.lt.s32.totalorder %v188_v0, 0 }
   0x4   :  { %v7_v2 = vshrl.u32 %v6_v1, 23  ;;  %v10_v6 = vand.u32 8388607, %v3_v3  ;;  %v174_v1 = vmov 0   ;;  %vm232_vm13 = vcmp.le.f32.partialorder %v3_v3, 0.7853982 }
   0x6   :  { %v158_v4 = vadd.s32 4294967169, %v7_v2  ;;  %v11_v9 = vor.u32 8388608, %v10_v6 }
   0x8   :  { %v13_v5 = vadd.s32 1, %v158_v4  ;;  %v197_v28 = vshll.u32 %v11_v9, 8 }
   0xa   :  { %vm14_vm0 = vcmp.gt.s32.totalorder %v13_v5, 0  ;;  %v52_v40 = vand.u32 65535, %v197_v28  ;;  %v53_v41 = vshrl.u32 %v197_v28, 16 }
   0xb   :  { %v15_v7 = vsel %vm14_vm0, %v13_v5, 0 }
   0xc   :  { %v17_v8 = vand.u32 31, %v15_v7  ;;  %v194_v10 = vshrl.u32 %v15_v7, 5 }
   0xe   :  { %v18_v11 = vsub.s32 32, %v17_v8  ;;  %v20_v13 = vshll.u32 %v168_v12, %v17_v8  ;;  %v23_v15 = vshll.u32 %v169_v14, %v17_v8  ;;  %v26_v17 = vshll.u32 %v170_v16, %v17_v8 }
   0xf   :  { %v29_v19 = vshll.u32 %v171_v18, %v17_v8  ;;  %v32_v21 = vshll.u32 %v172_v20, %v17_v8  ;;  %vm35_vm1 = vcmp.lt.s32.totalorder %v194_v10, 1  ;;  %vm38_vm2 = vcmp.lt.s32.totalorder %v194_v10, 4 }
  0x10   :  { %v21_v22 = vshrl.u32 %v169_v14, %v18_v11  ;;  %v24_v23 = vshrl.u32 %v170_v16, %v18_v11  ;;  %v27_v24 = vshrl.u32 %v171_v18, %v18_v11  ;;  %v30_v25 = vshrl.u32 %v172_v20, %v18_v11 }
  0x11   :  { %v33_v27 = vshrl.u32 %v173_v26, %v18_v11  ;;  %vm37_vm3 = vcmp.lt.s32.totalorder %v194_v10, 3  ;;  %vm36_vm4 = vcmp.lt.s32.totalorder %v194_v10, 2  ;;  %v19_v48 = vshrl.u32 %v168_v12, %v18_v11 }
  0x12   :  { %v22_v29 = vor.u32 %v21_v22, %v20_v13  ;;  %v25_v30 = vor.u32 %v24_v23, %v23_v15  ;;  %v28_v31 = vor.u32 %v27_v24, %v26_v17  ;;  %v31_v32 = vor.u32 %v30_v25, %v29_v19 }
  0x13   :  { %v34_v33 = vor.u32 %v33_v27, %v32_v21 }
  0x14   :  { %v43_v34 = vsel %vm35_vm1, %v22_v29, %v25_v30  ;;  %v47_v35 = vsel %vm35_vm1, %v25_v30, %v28_v31  ;;  %v44_v36 = vsel %vm38_vm2, %v31_v32, 920167782  ;;  %v39_v61 = vsel %vm35_vm1, %v19_v48, %v22_v29 }
  0x15   :  { %v48_v37 = vsel %vm38_vm2, %v34_v33, 1326507024  ;;  %v45_v38 = vsel %vm37_vm3, %v28_v31, %v44_v36  ;;  %v40_v63 = vsel %vm38_vm2, %v28_v31, 2102212464  ;;  %vm146_vm1 = vweird.f32 %v188_v0 }
  0x16   :  { %v49_v39 = vsel %vm37_vm3, %v31_v32, %v48_v37  ;;  %v46_v42 = vsel %vm36_vm4, %v43_v34, %v45_v38  ;;  %v41_v12 = vsel %vm37_vm3, %v25_v30, %v40_v63 }
  0x17   :  { %v50_v43 = vsel %vm36_vm4, %v47_v35, %v49_v39  ;;  %v76_v46 = vand.u32 65535, %v46_v42  ;;  %v77_v47 = vshrl.u32 %v46_v42, 16  ;;  %v42_v10 = vsel %vm36_vm4, %v39_v61, %v41_v12 }
  0x18   :  { %v54_v44 = vand.u32 65535, %v50_v43  ;;  %v55_v45 = vshrl.u32 %v50_v43, 16  ;;  %v96_v23 = vmul.u32 %v197_v28, %v42_v10 }
  0x19   :  { %v78_v52 = vmul.u32 %v76_v46, %v52_v40  ;;  %v79_v53 = vmul.u32 %v77_v47, %v52_v40  ;;  %v80_v54 = vmul.u32 %v76_v46, %v53_v41  ;;  %v81_v58 = vmul.u32 %v77_v47, %v53_v41 }
  0x1a   :  { %v56_v49 = vmul.u32 %v54_v44, %v52_v40  ;;  %v57_v50 = vmul.u32 %v55_v45, %v52_v40  ;;  %v58_v51 = vmul.u32 %v54_v44, %v53_v41  ;;  %v59_v55 = vmul.u32 %v55_v45, %v53_v41 }
  0x1b   :  { %v82_v59 = vshll.u32 %v79_v53, 16  ;;  %v84_v60 = vshll.u32 %v80_v54, 16  ;;  %v83_v9 = vshrl.u32 %v79_v53, 16  ;;  %v85_v16 = vshrl.u32 %v80_v54, 16 }
  0x1c   :  { %v60_v56 = vshll.u32 %v57_v50, 16  ;;  %v62_v57 = vshll.u32 %v58_v51, 16  ;;  %v61_v5 = vshrl.u32 %v57_v50, 16  ;;  %v63_v13 = vshrl.u32 %v58_v51, 16 }
  0x1d   :  { %vm86_vm6 = vc.u32 %v78_v52, %v82_v59  ;;  %v88_v4 = vadd.s32 %v82_v59, %v78_v52 }
  0x1e   :  { %vm64_vm5 = vc.u32 %v56_v49, %v60_v56  ;;  %v66_v62 = vadd.s32 %v60_v56, %v56_v49  ;;  %v87_v7 = vsel %vm86_vm6, 1, %v174_v1 }
  0x1f   :  { %v65_v2 = vsel %vm64_vm5, 1, %v174_v1  ;;  %v89_v11 = vadd.s32 %v87_v7, %v81_v58  ;;  %vm90_vm8 = vc.u32 %v88_v4, %v84_v60  ;;  %v92_v19 = vadd.s32 %v88_v4, %v84_v60 }
  0x20   :  { %v67_v6 = vadd.s32 %v65_v2, %v59_v55  ;;  %vm68_vm7 = vc.u32 %v66_v62, %v62_v57  ;;  %v91_v15 = vsel %vm90_vm8, 1, %v174_v1 }
  0x21   :  { %v69_v8 = vsel %vm68_vm7, 1, %v174_v1  ;;  %v93_v17 = vadd.s32 %v91_v15, %v89_v11 }
  0x22   :  { %v71_v14 = vadd.s32 %v69_v8, %v67_v6 }
  0x23   :  { %v94_v20 = vadd.s32 %v93_v17, %v83_v9 }
  0x24   :  { %v72_v18 = vadd.s32 %v71_v14, %v61_v5 }
  0x25   :  { %v95_v22 = vadd.s32 %v94_v20, %v85_v16 }
  0x26   :  { %v73_v21 = vadd.s32 %v72_v18, %v63_v13 }
  0x27   :  { %v99_v24 = vadd.s32 1, %v95_v22 }
  0x28   :  { %vm98_vm9 = vc.u32 %v73_v21, %v92_v19  ;;  %v97_v35 = vadd.s32 %v92_v19, %v73_v21 }
  0x29   :  { %v100_v25 = vsel %vm98_vm9, %v99_v24, %v95_v22 }
  0x2a   :  { %v101_v26 = vadd.s32 %v100_v25, %v96_v23 }
  0x2c   :  { %v102_v27 = vadd.s32 536870912, %v101_v26 }
  0x2e   :  { %v103_v28 = vshrl.u32 %v102_v27, 30 }
  0x30   :  { %v104_v29 = vshll.u32 %v103_v28, 30  ;;  %v127_v50 = vsub.s32 4, %v103_v28 }
  0x32   :  { %v105_v30 = vsub.s32 %v101_v26, %v104_v29  ;;  %v128_v55 = vsel %vm5_vm12, %v127_v50, %v103_v28 }
  0x33   :  { %v130_v58 = vsel %vm232_vm13, 0, %v128_v55 }
  0x34   :  { %vm106_vm10 = vcmp.lt.s32.totalorder %v105_v30, 0  ;;  %v107_v31 = vsub.s32 0, %v105_v30  ;;  %v147_v63 = vand.u32 3, %v130_v58 }
  0x36   :  { %v108_v32 = vsel %vm106_vm10, %v107_v31, %v105_v30  ;;  %vm152_vm14 = vcmp.eq.s32.totalorder %v147_v63, 2  ;;  %vm149_vm15 = vcmp.eq.s32.totalorder %v147_v63, 0  ;;  %vm148_vm0 = vcmp.lt.s32.totalorder %v147_v63, 2 }
  0x37   :  { %v109_v33 = vclz %v108_v32 }
  0x39   :  { %v159_v34 = vadd.s32 4294967294, %v109_v33 }
  0x3b   :  { %vm160_vm11 = vcmp.lt.s32.totalorder %v159_v34, 0 }
  0x3c   :  { %v112_v36 = vsel %vm160_vm11, 0, %v159_v34 }
  0x3d   :  { %v113_v37 = vsub.s32 32, %v112_v36  ;;  %v114_v38 = vshll.u32 %v105_v30, %v112_v36  ;;  %v117_v39 = vsub.s32 4294967266, %v112_v36 }
  0x3f   :  { %v115_v40 = vshrl.u32 %v97_v35, %v113_v37  ;;  %v118_v41 = vadd.s32 127, %v117_v39 }
  0x41   :  { %v116_v42 = vor.u32 %v115_v40, %v114_v38  ;;  %v119_v43 = vshll.u32 %v118_v41, 23 }
  0x43   :  { %v120_v44 = vor.u32 4788187, %v119_v43  ;;  %v123_v45 = vcvt.s32.f32 %v116_v42 }
  0x45   :  { %v121_v46 = vand.u32 2147483647, %v120_v44 }
  0x47   :  { %v124_v47 = vmul.f32 %v123_v45, %v121_v46 }
  0x49   :  { %v125_v48 = vxor.u32 2147483648, %v124_v47 }
  0x4b   :  { %v126_v49 = vsel %vm5_vm12, %v125_v48, %v124_v47 }
  0x4c   :  { %v129_v51 = vsel %vm232_vm13, %v188_v0, %v126_v49 }
  0x4d   :  { %v131_v52 = vmul.f32 %v129_v51, %v129_v51 }
  0x4f   :  { %v132_v53 = vmul.f32 -0.001358992, %v131_v52  ;;  %v139_v54 = vmul.f32 -0.00019511016, %v131_v52 }
  0x51   :  { %v133_v56 = vadd.f32 0.041655596, %v132_v53  ;;  %v140_v57 = vadd.f32 0.008332121, %v139_v54 }
  0x53   :  { %v134_v59 = vmul.f32 %v133_v56, %v131_v52  ;;  %v141_v60 = vmul.f32 %v140_v57, %v131_v52 }
  0x55   :  { %v135_v61 = vadd.f32 -0.4999988, %v134_v59  ;;  %v142_v62 = vadd.f32 -0.16666654, %v141_v60 }
  0x57   :  { %v136_v1 = vmul.f32 %v135_v61, %v131_v52  ;;  %v143_v2 = vmul.f32 %v142_v62, %v131_v52 }
  0x59   :  { %v137_v4 = vadd.f32 1.0, %v136_v1  ;;  %v144_v5 = vadd.f32 1.0, %v143_v2 }
  0x5b   :  { %v145_v6 = vmul.f32 %v144_v5, %v129_v51  ;;  %v153_v7 = vxor.u32 2147483648, %v137_v4 }
  0x5d   :  { %v150_v8 = vxor.u32 2147483648, %v145_v6  ;;  %v154_v9 = vsel %vm152_vm14, %v153_v7, %v145_v6 }
  0x5f   :  { %v151_v0 = vsel %vm149_vm15, %v137_v4, %v150_v8 }
  0x60   :  { %v155_v11 = vsel %vm148_vm0, %v151_v0, %v154_v9 }
  0x61   :  { %v156_v12 = vsel %vm146_vm1, nan, %v155_v11 }
  0x62   :  { %157 = vst [vmem:[%s246_s1] sm:$0x1] %v156_v12 }

// kernel: decoding_net_forward.1
= control target key start
LH: loop header
LB: loop body
LE: loop exit
PB: predicated region body
PF: predicated region fallthrough
CT: control target
= control target key end

     0   :  { %v843_v49 = vmov 0   ;;  %s1061_s1 = inlined_call_operand.vmem [shape: bf16[768,128], index: 1, kind: input, shape index: {}]   ;;  %s1062_s0 = inlined_call_operand.vmem [shape: bf16[16,768], index: 0, kind: input, shape index: {}]   ;;  %s1063_s3 = inlined_call_operand.vmem [shape: f32[16,1], index: 3, kind: input, shape index: {}]   ;;  %s1064_s2 = inlined_call_operand.vmem [shape: f32[1,128], index: 2, kind: input, shape index: {}]   ;;  %s1065_s4 = inlined_call_operand.vmem [shape: f32[1,128], index: 4, kind: output, shape index: {}]  }
   0x1   :  { %v799_v0 = vld [vmem:[%s1061_s1 + $0x38] sm:$0xff]  ;;  %v798_v4 = vld [vmem:[%s1061_s1 + $0x30] sm:$0xff]  ;;  %v797_v8 = vld [vmem:[%s1061_s1 + $0x28] sm:$0xff]  ;;  %841 = vset.pattern.permute.xlu0 %v843_v49 }
   0x2   :  { %v807_v1 = vld [vmem:[%s1061_s1 + $0x78] sm:$0xff]  ;;  %445 = vmatpush.bf16.msra.mxu0 %v799_v0  ;;  %v806_v5 = vld [vmem:[%s1061_s1 + $0x70] sm:$0xff]  ;;  %v805_v9 = vld [vmem:[%s1061_s1 + $0x68] sm:$0xff] }
   0x3   :  { %v815_v2 = vld [vmem:[%s1061_s1 + $0xb8] sm:$0xff]  ;;  %459 = vmatpush.bf16.msra.mxu1 %v807_v1  ;;  %v814_v6 = vld [vmem:[%s1061_s1 + $0xb0] sm:$0xff]  ;;  %v813_v10 = vld [vmem:[%s1061_s1 + $0xa8] sm:$0xff] }
   0x4   :  { %v823_v3 = vld [vmem:[%s1061_s1 + $0xf8] sm:$0xff]  ;;  %473 = vmatpush.bf16.msra.mxu2 %v815_v2  ;;  %v822_v7 = vld [vmem:[%s1061_s1 + $0xf0] sm:$0xff]  ;;  %v821_v11 = vld [vmem:[%s1061_s1 + $0xe8] sm:$0xff] }
   0x5   :  { %487 = vmatpush.bf16.msra.mxu3 %v823_v3  ;;  %v796_v12 = vld [vmem:[%s1061_s1 + $0x20] sm:$0xff]  ;;  %v795_v16 = vld [vmem:[%s1061_s1 + $0x18] sm:$0xff]  ;;  %v794_v20 = vld [vmem:[%s1061_s1 + $0x10] sm:$0xff] }
   0x6   :  { %446 = vmatpush.bf16.msra.mxu0 %v798_v4  ;;  %v804_v13 = vld [vmem:[%s1061_s1 + $0x60] sm:$0xff]  ;;  %v803_v17 = vld [vmem:[%s1061_s1 + $0x58] sm:$0xff]  ;;  %v802_v21 = vld [vmem:[%s1061_s1 + $0x50] sm:$0xff] }
   0x7   :  { %460 = vmatpush.bf16.msra.mxu1 %v806_v5  ;;  %v812_v14 = vld [vmem:[%s1061_s1 + $0xa0] sm:$0xff]  ;;  %v811_v18 = vld [vmem:[%s1061_s1 + $0x98] sm:$0xff]  ;;  %v810_v22 = vld [vmem:[%s1061_s1 + $0x90] sm:$0xff] }
   0x8   :  { %474 = vmatpush.bf16.msra.mxu2 %v814_v6  ;;  %v820_v15 = vld [vmem:[%s1061_s1 + $0xe0] sm:$0xff]  ;;  %v819_v19 = vld [vmem:[%s1061_s1 + $0xd8] sm:$0xff]  ;;  %v818_v23 = vld [vmem:[%s1061_s1 + $0xd0] sm:$0xff] }
   0x9   :  { %488 = vmatpush.bf16.msra.mxu3 %v822_v7  ;;  %v793_v24 = vld [vmem:[%s1061_s1 + $0x8] sm:$0xff]  ;;  %v792_v28 = vld [vmem:[%s1061_s1] sm:$0xff]  ;;  %v831_v31 = vld [vmem:[%s1061_s1 + $0x138] sm:$0xff] }
   0xa   :  { %447 = vmatpush.bf16.msra.mxu0 %v797_v8  ;;  %v801_v25 = vld [vmem:[%s1061_s1 + $0x48] sm:$0xff]  ;;  %v800_v29 = vld [vmem:[%s1061_s1 + $0x40] sm:$0xff]  ;;  %v789_v33 = vld [vmem:[%s1062_s0 + $0x14] sm:$0xf0] }
   0xb   :  { %461 = vmatpush.bf16.msra.mxu1 %v805_v9  ;;  %v809_v26 = vld [vmem:[%s1061_s1 + $0x88] sm:$0xff]  ;;  %v808_v30 = vld [vmem:[%s1061_s1 + $0x80] sm:$0xff]  ;;  %v574_v35 = vld [vmem:[%s1062_s0 + $0x18] sm:$0xf0] }
   0xc   :  { %475 = vmatpush.bf16.msra.mxu2 %v813_v10  ;;  %v817_v27 = vld [vmem:[%s1061_s1 + $0xc8] sm:$0xff]  ;;  %v572_v32 = vld [vmem:[%s1062_s0] sm:$0xf]  ;;  %v786_v34 = vld [vmem:[%s1062_s0 + $0x4] sm:$0xf] }
   0xd   :  { %489 = vmatpush.bf16.msra.mxu3 %v821_v11  ;;  %v839_v36 = vld [vmem:[%s1061_s1 + $0x178] sm:$0xff]  ;;  %v580_v37 = vld [vmem:[%s1062_s0 + $0x8] sm:$0xf]  ;;  %v790_v38 = vld [vmem:[%s1062_s0 + $0x1c] sm:$0xf0]  ;;  %v573_v42 = vor.u32 %v789_v33, %v572_v32  ;;  %v577_v43 = vor.u32 %v786_v34, %v574_v35 }
   0xe   :  { %448 = vmatpush.bf16.msra.mxu0 %v796_v12  ;;  %v816_v39 = vld [vmem:[%s1061_s1 + $0xc0] sm:$0xff]  ;;  %v787_v40 = vld [vmem:[%s1062_s0 + $0xc] sm:$0xf]  ;;  %v581_v44 = vor.u32 %v790_v38, %v580_v37  ;;  %v830_v45 = vld [vmem:[%s1061_s1 + $0x130] sm:$0xff] }
   0xf   :  { %462 = vmatpush.bf16.msra.mxu1 %v804_v13  ;;  %v582_v41 = vld [vmem:[%s1062_s0 + $0x20] sm:$0xf0]  ;;  %v838_v47 = vld [vmem:[%s1061_s1 + $0x170] sm:$0xff]  ;;  %v829_v50 = vld [vmem:[%s1061_s1 + $0x128] sm:$0xff] }
  0x10   :  { %476 = vmatpush.bf16.msra.mxu2 %v812_v14  ;;  %v585_v46 = vor.u32 %v787_v40, %v582_v41  ;;  %v544_v48 = vld [vmem:[%s1063_s3] sm:$0xff]  ;;  %v837_v51 = vld [vmem:[%s1061_s1 + $0x168] sm:$0xff]  ;;  %v827_v55 = vld [vmem:[%s1061_s1 + $0x118] sm:$0xff] }
  0x11   :  { %490 = vmatpush.bf16.msra.mxu3 %v820_v15  ;;  %548 = vperm.xlu0 %841, %v544_v48   ;;  %v828_v52 = vld [vmem:[%s1061_s1 + $0x120] sm:$0xff]  ;;  %v545_v54 = vld [vmem:[%s1063_s3 + $0x8] sm:$0xff]  ;;  %v835_v56 = vld [vmem:[%s1061_s1 + $0x158] sm:$0xff] }
  0x12   :  { %449 = vmatpush.bf16.msra.mxu0 %v795_v16  ;;  %v836_v53 = vld [vmem:[%s1061_s1 + $0x160] sm:$0xff]  ;;  %v826_v57 = vld [vmem:[%s1061_s1 + $0x110] sm:$0xff]  ;;  %v825_v59 = vld [vmem:[%s1061_s1 + $0x108] sm:$0xff] }
  0x13   :  { %463 = vmatpush.bf16.msra.mxu1 %v803_v17  ;;  %v834_v58 = vld [vmem:[%s1061_s1 + $0x150] sm:$0xff]  ;;  %v833_v60 = vld [vmem:[%s1061_s1 + $0x148] sm:$0xff]  ;;  %v824_v61 = vld [vmem:[%s1061_s1 + $0x100] sm:$0xff] }
  0x14   :  { %477 = vmatpush.bf16.msra.mxu2 %v811_v18  ;;  %v588_v62 = vld [vmem:[%s1062_s0 + $0x10] sm:$0xf]  ;;  %v791_v63 = vld [vmem:[%s1062_s0 + $0x24] sm:$0xf0]  ;;  %v832_v0 = vld [vmem:[%s1061_s1 + $0x140] sm:$0xff] }
  0x15   :  { %491 = vmatpush.bf16.msra.mxu3 %v819_v19  ;;  %v788_v1 = vld [vmem:[%s1062_s0 + $0x14] sm:$0xf]  ;;  %v590_v2 = vld [vmem:[%s1062_s0 + $0x28] sm:$0xf0]  ;;  %v589_v3 = vor.u32 %v791_v63, %v588_v62 }
  0x16   :  { %450 = vmatpush.bf16.msra.mxu0 %v794_v20  ;;  %v593_v4 = vor.u32 %v788_v1, %v590_v2 }
  0x17   :  { %464 = vmatpush.bf16.msra.mxu1 %v802_v21 }
  0x18   :  { %478 = vmatpush.bf16.msra.mxu2 %v810_v22 }
  0x19   :  { %492 = vmatpush.bf16.msra.mxu3 %v818_v23  ;;  %553 = vperm.xlu0 %841, %v545_v54  }
  0x1a   :  { %451 = vmatpush.bf16.msra.mxu0 %v793_v24  ;;  %v842_v24 = vld [vmem:[%s1064_s2] ss:$0 sm:$0xff] }
  0x1b   :  { %465 = vmatpush.bf16.msra.mxu1 %v801_v25 }
  0x1c   :  { %479 = vmatpush.bf16.msra.mxu2 %v809_v26 }
  0x1d   :  { %493 = vmatpush.bf16.msra.mxu3 %v817_v27 }
  0x1e   :  { %452 = vmatpush.bf16.msra.mxu0 %v792_v28 }
  0x1f   :  { %466 = vmatpush.bf16.msra.mxu1 %v800_v29 }
  0x20   :  { %480 = vmatpush.bf16.msra.mxu2 %v808_v30 }
  0x21   :  { %494 = vmatpush.bf16.msra.mxu3 %v816_v39  ;;  %453 = vmatmul.bf16.vlgmr.msra.gmra.mxu0 %v573_v42 }
  0x22   :  { %501 = vmatpush.bf16.msrb.mxu0 %v831_v31  ;;  %467 = vmatmul.bf16.vlgmr.msra.gmra.mxu1 %v577_v43 }
  0x23   :  { %515 = vmatpush.bf16.msrb.mxu1 %v839_v36  ;;  %481 = vmatmul.bf16.vlgmr.msra.gmra.mxu2 %v581_v44 }
  0x24   :  { %495 = vmatmul.bf16.vlgmr.msra.gmra.mxu3 %v585_v46 }
  0x26   :  { %502 = vmatpush.bf16.msrb.mxu0 %v830_v45 }
  0x27   :  { %516 = vmatpush.bf16.msrb.mxu1 %v838_v47 }
  0x2a   :  { %503 = vmatpush.bf16.msrb.mxu0 %v829_v50 }
  0x2b   :  { %517 = vmatpush.bf16.msrb.mxu1 %v837_v51 }
  0x2e   :  { %504 = vmatpush.bf16.msrb.mxu0 %v828_v52 }
  0x2f   :  { %518 = vmatpush.bf16.msrb.mxu1 %v836_v53 }
  0x32   :  { %505 = vmatpush.bf16.msrb.mxu0 %v827_v55 }
  0x33   :  { %519 = vmatpush.bf16.msrb.mxu1 %v835_v56 }
  0x36   :  { %506 = vmatpush.bf16.msrb.mxu0 %v826_v57 }
  0x37   :  { %520 = vmatpush.bf16.msrb.mxu1 %v834_v58 }
  0x3a   :  { %507 = vmatpush.bf16.msrb.mxu0 %v825_v59 }
  0x3b   :  { %521 = vmatpush.bf16.msrb.mxu1 %v833_v60 }
  0x3e   :  { %508 = vmatpush.bf16.msrb.mxu0 %v824_v61 }
  0x3f   :  { %522 = vmatpush.bf16.msrb.mxu1 %v832_v0 }
  0x41   :  { %509 = vmatmul.bf16.vlgmr.msrb.gmra.mxu0 %v589_v3 }
  0x42   :  { %523 = vmatmul.bf16.vlgmr.msrb.gmra.mxu1 %v593_v4 }
  0x83   :  { %v549_v21 = vpop.permute.xlu0 %548 }
  0x8b   :  { %v554_v31 = vpop.permute.xlu0 %553 }
  0x9e   :  { %v454_v5 = vpop.f32.mrf.mxu0 }
  0x9f   :  { %v468_v6 = vpop.f32.mrf.mxu1 }
  0xa0   :  { %v469_v9 = vadd.f32 %v468_v6, %v454_v5 }
  0xa6   :  { %v482_v7 = vpop.f32.mrf.mxu2  ;;  %v456_v8 = vpop.f32.mrf.mxu0 }
  0xa7   :  { %v470_v10 = vpop.f32.mrf.mxu1  ;;  %v496_v11 = vpop.f32.mrf.mxu3  ;;  %v483_v12 = vadd.f32 %v482_v7, %v469_v9 }
  0xa8   :  { %v471_v13 = vadd.f32 %v470_v10, %v456_v8 }
  0xa9   :  { %v497_v16 = vadd.f32 %v496_v11, %v483_v12 }
  0xae   :  { %v484_v14 = vpop.f32.mrf.mxu2 }
  0xaf   :  { %v485_v18 = vadd.f32 %v484_v14, %v471_v13  ;;  %v498_v20 = vpop.f32.mrf.mxu3 }
  0xb1   :  { %v499_v22 = vadd.f32 %v498_v20, %v485_v18 }
  0xbe   :  { %v510_v15 = vpop.f32.mrf.mxu0 }
  0xbf   :  { %v524_v17 = vpop.f32.mrf.mxu1  ;;  %v511_v19 = vadd.f32 %v510_v15, %v497_v16 }
  0xc1   :  { %v525_v23 = vadd.f32 %v524_v17, %v511_v19 }
  0xc3   :  { %v542_v28 = vadd.f32 %v842_v24, %v525_v23 }
  0xc5   :  { %v556_v32 = vmul.f32 %v549_v21, %v542_v28 }
  0xc6   :  { %v512_v25 = vpop.f32.mrf.mxu0 }
  0xc7   :  { %v513_v26 = vadd.f32 %v512_v25, %v499_v22  ;;  %v526_v27 = vpop.f32.mrf.mxu1 }
  0xc9   :  { %v527_v29 = vadd.f32 %v526_v27, %v513_v26 }
  0xcb   :  { %v543_v30 = vadd.f32 %v842_v24, %v527_v29 }
  0xcd   :  { %v557_v33 = vmul.f32 %v554_v31, %v543_v30 }
  0xcf   :  { %v558_v34 = vadd.f32 %v557_v33, %v556_v32 }
  0xd1   :  { %v559_v35 = vrot.slane %v558_v34, 4 }
  0xd3   :  { %v560_v36 = vadd.f32 %v559_v35, %v558_v34 }
  0xd5   :  { %v561_v37 = vrot.slane %v560_v36, 2 }
  0xd7   :  { %v562_v38 = vadd.f32 %v561_v37, %v560_v36 }
  0xd9   :  { %v563_v39 = vrot.slane %v562_v38, 1 }
  0xdb   :  { %v564_v40 = vadd.f32 %v563_v39, %v562_v38 }
  0xdd   :  { %565 = vst [vmem:[%s1065_s4] sm:$0x1] %v564_v40 }

</bundles_post_ra>
